<compile_context>
chip_gen: v6e
topology: v6e:2x2x1
jax: 0.10.0
libtpu: 0.0.40
codegen_flags: <defaults>
</compile_context>

<pallas_src>
import numpy as np
import jax
import jax.numpy as jnp
from jax.experimental import pallas as pl
from jax.experimental.pallas import tpu as pltpu


# ---------------------------------------------------------------------------
# Host-side (numpy) faithful port of IcosahedronConv2d.__init__ helpers.
# Graph preprocessing runs once at init; it is not a tensor op -> stays off TPU.
# ---------------------------------------------------------------------------
def build_icosahedron():
    phi = (1.0 + np.sqrt(5.0)) / 2.0
    verts = np.array([
        [-1,  phi, 0], [1,  phi, 0], [-1, -phi, 0], [1, -phi, 0],
        [0, -1,  phi], [0, 1,  phi], [0, -1, -phi], [0, 1, -phi],
        [phi, 0, -1], [phi, 0, 1], [-phi, 0, -1], [-phi, 0, 1],
    ], dtype=np.float32)
    faces = [
        [0, 11, 5], [0, 5, 1], [0, 1, 7], [0, 7, 10], [0, 10, 11],
        [1, 5, 9], [5, 11, 4], [11, 10, 2], [10, 7, 6], [7, 1, 8],
        [3, 9, 4], [3, 4, 2], [3, 2, 6], [3, 6, 8], [3, 8, 9],
        [4, 9, 5], [2, 4, 11], [6, 2, 10], [8, 6, 7], [9, 8, 1],
    ]
    edges, seen = [], set()
    for f in faces:
        for a, b in ((f[0], f[1]), (f[1], f[2]), (f[2], f[0])):
            key = (min(a, b), max(a, b))
            if key not in seen:
                seen.add(key)
                edges.append([key[0], key[1]])
    return verts, edges


def get_neighbors(list_edges, nbr_vert):
    neighbors = [[] for _ in range(nbr_vert)]
    for v1, v2 in list_edges:
        neighbors[v1].append(v2)
        neighbors[v2].append(v1)
    return neighbors


def sort_neighbors(list_neighbors, nbr_vert):
    new_neighbors = [[] for _ in range(nbr_vert)]
    for i in range(nbr_vert):
        neighbors = list_neighbors[i].copy()
        vert = neighbors[0]
        new_neighbors[i].append(vert)
        neighbors.remove(vert)
        while len(neighbors) != 0:
            common = list(set(neighbors).intersection(list_neighbors[vert]))
            vert = common[0]
            new_neighbors[i].append(vert)
            neighbors.remove(vert)
    return new_neighbors


def sort_rotation(verts, list_neighbors, nbr_vert):
    # Faithful port of the PyTorch module (including the `> 1` threshold).
    new_neighbors = [[] for _ in range(nbr_vert)]
    for i in range(nbr_vert):
        p0 = verts[i]
        p1 = verts[list_neighbors[i][0]]
        p2 = verts[list_neighbors[i][1]]
        v1 = p1 - p0
        v2 = p2 - p1
        vn = np.cross(v1, v2)
        n = vn / np.linalg.norm(vn)
        milieu = p1 + v2 / 2
        v3 = milieu - p0
        cg = p0 + 2 * v3 / 3
        if np.dot(n, cg) > 1:
            new_neighbors[i] = list_neighbors[i]
        else:
            list_neighbors[i] = list(reversed(list_neighbors[i]))
            new_neighbors[i] = list_neighbors[i]
    return new_neighbors


def get_mat_neighbors(list_neighbors, nbr_vert):
    mat = np.zeros((nbr_vert, nbr_vert * 9), dtype=np.float32)
    for index_cam in range(nbr_vert):
        mat[index_cam][index_cam * 9] = 1.0
        for j in range(len(list_neighbors[index_cam])):
            mat[list_neighbors[index_cam][j]][index_cam * 9 + j + 1] = 1.0
    return mat


# ---------------------------------------------------------------------------
# Host-side weight folding (numpy, exact f32): gather matrix + Conv2d(3x3)
# -> one matmul.  The output (lane) dim is zero-padded to a multiple of 128
# so kernel stores are lane-dense unmasked vst's.
# ---------------------------------------------------------------------------
def fold_weights(mat_neighbors, conv_w, conv_b, lane_multiple=128):
    """Returns (w_eff (V*F, Npad) f32, bias_row (1, Npad) f32)."""
    mat = np.asarray(mat_neighbors, np.float32)
    w = np.asarray(conv_w, np.float32)
    b = np.asarray(conv_b, np.float32)
    V = mat.shape[0]
    O, F = w.shape[0], w.shape[1]
    mat3 = mat.reshape(V, V, 9)            # [v_src, v_dst, j]
    w3 = w.reshape(O, F, 9)                # [o, f, j]
    # Weff[v'*F+f, v*O+o] = sum_j mat3[v',v,j] * w3[o,f,j]
    w_eff = np.einsum("pvj,ofj->pfvo", mat3, w3).reshape(V * F, V * O)
    bias_row = np.tile(b, V).reshape(1, V * O)
    N = V * O
    n_pad = (-N) % lane_multiple
    if n_pad:
        w_eff = np.pad(w_eff, ((0, 0), (0, n_pad)))
        bias_row = np.pad(bias_row, ((0, 0), (0, n_pad)))
    return jnp.asarray(w_eff), jnp.asarray(bias_row)


# ---------------------------------------------------------------------------
# Kernels
# ---------------------------------------------------------------------------
def _fused_kernel(x_ref, w_ref, b_ref, o_ref):
    # x arrives in its HBM dtype (f32); cast in-kernel right before the MXU
    # (the VPU cast hides under the matmul; no extra wrapper-side HBM pass).
    x = x_ref[...].astype(w_ref.dtype)
    acc = jnp.dot(x, w_ref[...], preferred_element_type=jnp.float32)
    o_ref[...] = (acc + b_ref[...]).astype(o_ref.dtype)


def _fused_kernel_ktiled(x_ref, w_ref, b_ref, o_ref, acc_ref):
    # P3 accumulator pattern: zero at k==0, add bias + store at k==last.
    kk = pl.program_id(1)

    @pl.when(kk == 0)
    def _init():
        acc_ref[...] = jnp.zeros_like(acc_ref)

    x = x_ref[...].astype(w_ref.dtype)
    acc_ref[...] += jnp.dot(x, w_ref[...], preferred_element_type=jnp.float32)

    @pl.when(kk == pl.num_programs(1) - 1)
    def _finalize():
        o_ref[...] = (acc_ref[...] + b_ref[...]).astype(o_ref.dtype)


# ---------------------------------------------------------------------------
# Wrapper
# ---------------------------------------------------------------------------
def _choose_tile_m(B, tm_vmem_cap, num_cores):
    """Batch tile: full extent for tiny B; otherwise >=2 grid steps per core,
    rounded to a lane/sublane-friendly multiple, capped by the VMEM budget."""
    if B <= 64:
        return B
    tm = int(min(B, max(8, tm_vmem_cap), -(-B // (2 * max(1, num_cores)))))
    for m in (256, 128, 8):
        if tm >= m:
            return (tm // m) * m
    return 8


def icosahedron_conv2d_forward(x, w_eff, bias_row, out_channels,
                               compute_dtype=jnp.float32,
                               out_dtype=jnp.float32,
                               force_k_tiling=False, tk=512):
    """x: (B, V, F) -> (B, V, O).  Single fused pallas_call.

    compute_dtype: MXU operand dtype (bf16 recommended on v5e/v6e/v7x).
    out_dtype:     HBM output dtype (bf16 halves output traffic if acceptable).
    """
    B, V, F = x.shape
    O = int(out_channels)
    K = V * F
    N = V * O
    Kw, Npad = w_eff.shape
    assert Kw == K and Npad >= N and Npad % 128 == 0
    assert bias_row.shape == (1, Npad)

    xf = x.reshape(B, K)                  # metadata-only reshape; x stays f32 in HBM
    w = w_eff.astype(compute_dtype)       # one-time cast of the small folded weight
    b = bias_row.astype(jnp.float32)      # bias added after f32 accumulation

    s_x = jnp.dtype(x.dtype).itemsize
    s_w = jnp.dtype(compute_dtype).itemsize
    s_o = jnp.dtype(out_dtype).itemsize

    # ---- generation-aware VMEM budget (clamped to the real device VMEM) ----
    try:
        info = pltpu.get_tpu_info()
    except Exception:                      # old API / not a TPU -> conservative
        info = None
    vmem_cap = int(getattr(info, "vmem_capacity_bytes", 0) or (64 << 20))
    vmem_cap = min(vmem_cap, 128 << 20)
    budget = max(vmem_cap - (16 << 20), 16 << 20)   # headroom for compiler scratch
    num_cores = int(getattr(info, "num_cores", 0) or 2)

    w_bytes = K * Npad * s_w
    b_bytes = Npad * 4
    k_tiled = bool(force_k_tiling) or (w_bytes > budget // 2)

    def launch(single_buffer_resident):
        pmode = {}
        if single_buffer_resident and hasattr(pl, "Buffered"):
            # Constant-index blocks: double buffering buys nothing -> halve VMEM.
            pmode = dict(pipeline_mode=pl.Buffered(1))

        if not k_tiled:
            # ------- Path A: weight fully resident, 1-D batch grid ----------
            per_row = 2 * K * s_x + 2 * Npad * s_o     # x + out, double-buffered
            avail = max(budget - w_bytes - b_bytes, per_row * 8)
            tm = _choose_tile_m(B, avail // per_row, num_cores)
            resident = w_bytes + b_bytes + tm * per_row
            vmem_limit = int(min(max(resident + (4 << 20), 8 << 20),
                                 max(vmem_cap - (8 << 20), 32 << 20)))
            return pl.pallas_call(
                _fused_kernel,
                out_shape=jax.ShapeDtypeStruct((B, Npad), out_dtype),
                grid=(pl.cdiv(B, tm),),
                in_specs=[
                    pl.BlockSpec((tm, K), lambda i: (i, 0)),
                    pl.BlockSpec((K, Npad), lambda i: (0, 0), **pmode),
                    pl.BlockSpec((1, Npad), lambda i: (0, 0), **pmode),
                ],
                out_specs=pl.BlockSpec((tm, Npad), lambda i: (i, 0)),
                compiler_params=pltpu.CompilerParams(
                    dimension_semantics=("parallel",),
                    vmem_limit_bytes=vmem_limit),
                cost_estimate=pl.CostEstimate(
                    flops=2 * B * K * Npad, transcendentals=0,
                    bytes_accessed=B * K * s_x + K * Npad * s_w
                    + Npad * 4 + B * Npad * s_o),
            )(xf, w, b)

        # -------- Path B: K-tiled f32 accumulator (large F*O / v7x) ---------
        tkk = max(128, (int(tk) // 128) * 128)
        k_pad = (-K) % tkk
        xk, wk = xf, w
        if k_pad:  # zero-pad the reduction axis (zeros do not change the sum)
            xk = jnp.pad(xf, ((0, 0), (0, k_pad)))
            wk = jnp.pad(w, ((0, k_pad), (0, 0)))
        Kp = K + k_pad
        nk = Kp // tkk
        fixed = 2 * tkk * Npad * s_w + b_bytes             # streamed weight + bias
        per_row = 2 * tkk * s_x + Npad * 4 + 2 * Npad * s_o  # x + f32 acc + out
        avail = max(budget - fixed, per_row * 8)
        tm = _choose_tile_m(B, avail // per_row, num_cores)
        resident = fixed + tm * per_row
        vmem_limit = int(min(max(resident + (4 << 20), 8 << 20),
                             max(vmem_cap - (8 << 20), 32 << 20)))
        return pl.pallas_call(
            _fused_kernel_ktiled,
            out_shape=jax.ShapeDtypeStruct((B, Npad), out_dtype),
            grid=(pl.cdiv(B, tm), nk),
            in_specs=[
                pl.BlockSpec((tm, tkk), lambda i, kk: (i, kk)),
                pl.BlockSpec((tkk, Npad), lambda i, kk: (kk, 0)),
                pl.BlockSpec((1, Npad), lambda i, kk: (0, 0), **pmode),
            ],
            out_specs=pl.BlockSpec((tm, Npad), lambda i, kk: (i, 0)),
            scratch_shapes=[pltpu.VMEM((tm, Npad), jnp.float32)],
            compiler_params=pltpu.CompilerParams(
                dimension_semantics=("parallel", "arbitrary"),
                vmem_limit_bytes=vmem_limit),
            cost_estimate=pl.CostEstimate(
                flops=2 * B * Kp * Npad, transcendentals=0,
                bytes_accessed=B * Kp * s_x + Kp * Npad * s_w
                + Npad * 4 + B * Npad * s_o),
        )(xk, wk, b)

    try:
        out2d = jax.block_until_ready(launch(True))
    except Exception:
        # Fallback if this JAX build rejects single-buffered (Buffered(1)) blocks.
        out2d = jax.block_until_ready(launch(False))

    return out2d[:, :N].reshape(B, V, O)


# ---------------------------------------------------------------------------
# Pure-JAX reference (two-stage, lax conv, NCHW) -- mirrors the PyTorch module.
# HIGHEST precision so the reference itself is trustworthy f32.
# ---------------------------------------------------------------------------
def reference_forward(x, mat_neighbors, conv_w, conv_b):
    B, V, F = x.shape
    O = conv_w.shape[0]
    x1 = jnp.transpose(x, (0, 2, 1)).reshape(B * F, V)
    y1 = jnp.matmul(x1, mat_neighbors, precision=jax.lax.Precision.HIGHEST)
    patches = (y1.reshape(B, F, V, 3, 3)
                 .transpose(0, 2, 1, 3, 4)
                 .reshape(B * V, F, 3, 3))
    out = jax.lax.conv_general_dilated(
        patches, conv_w, window_strides=(1, 1), padding="VALID",
        dimension_numbers=("NCHW", "OIHW", "NCHW"),
        precision=jax.lax.Precision.HIGHEST)
    out = out + conv_b.reshape(1, O, 1, 1)
    return out.reshape(B, V, O)


if __name__ == "__main__":
    B, F, O = 2, 4, 8   # batch, conv in_channels (features), conv out_channels

    verts_np, edges = build_icosahedron()
    nbr_vert = int(np.max(edges)) + 1            # 12 cameras / vertices
    neigh = get_neighbors(edges, nbr_vert)
    neigh = sort_neighbors(neigh, nbr_vert)
    neigh = sort_rotation(verts_np, neigh, nbr_vert)
    mat_neighbors_np = get_mat_neighbors(neigh, nbr_vert)        # (12, 108)
    mat_neighbors = jnp.asarray(mat_neighbors_np)

    key = jax.random.PRNGKey(0)
    kx, kw, kb, kx2, kw2, kb2 = jax.random.split(key, 6)
    x = jax.random.normal(kx, (B, nbr_vert, F), dtype=jnp.float32)
    bound = 1.0 / np.sqrt(F * 9)
    conv_w = jax.random.uniform(kw, (O, F, 3, 3), jnp.float32, -bound, bound)
    conv_b = jax.random.uniform(kb, (O,), jnp.float32, -bound, bound)

    # Fold the neighbor-gather matrix into the conv weight (host-side, once).
    w_eff, bias_row = fold_weights(mat_neighbors_np, conv_w, conv_b)

    ref = jax.block_until_ready(
        reference_forward(x, mat_neighbors, conv_w, conv_b))

    # 1) f32-operand path (weight-resident kernel, lane-padded output).
    out_f32 = jax.block_until_ready(
        icosahedron_conv2d_forward(x, w_eff, bias_row, O,
                                   compute_dtype=jnp.float32))
    assert out_f32.shape == (B, nbr_vert, O)
    np.testing.assert_allclose(np.asarray(out_f32), np.asarray(ref),
                               rtol=5e-3, atol=5e-3)

    # 2) bf16-operand / bf16-output path (recommended default on v5e/v6e/v7x).
    out_bf16 = jax.block_until_ready(
        icosahedron_conv2d_forward(x, w_eff, bias_row, O,
                                   compute_dtype=jnp.bfloat16,
                                   out_dtype=jnp.bfloat16))
    np.testing.assert_allclose(np.asarray(out_bf16.astype(jnp.float32)),
                               np.asarray(ref), rtol=5e-2, atol=5e-2)

    # 3) Larger config forcing the K-tiled accumulator path (multi-step M grid
    #    with a partial last tile, zero-padded reduction axis) — the layout
    #    used when the folded weight no longer fits v7x's 64 MiB VMEM.
    B2, F2, O2 = 72, 30, 16
    x2 = jax.random.normal(kx2, (B2, nbr_vert, F2), dtype=jnp.float32)
    bound2 = 1.0 / np.sqrt(F2 * 9)
    conv_w2 = jax.random.uniform(kw2, (O2, F2, 3, 3), jnp.float32, -bound2, bound2)
    conv_b2 = jax.random.uniform(kb2, (O2,), jnp.float32, -bound2, bound2)
    w_eff2, bias_row2 = fold_weights(mat_neighbors_np, conv_w2, conv_b2)
    ref2 = jax.block_until_ready(
        reference_forward(x2, mat_neighbors, conv_w2, conv_b2))
    out2 = jax.block_until_ready(
        icosahedron_conv2d_forward(x2, w_eff2, bias_row2, O2,
                                   compute_dtype=jnp.float32,
                                   force_k_tiling=True, tk=128))
    np.testing.assert_allclose(np.asarray(out2), np.asarray(ref2),
                               rtol=5e-3, atol=5e-3)

    print("KERNEL_OK")
</pallas_src>

<mosaic_0001>
module attributes {stable_mosaic.version = 11 : i64} {
  func.func @_fused_kernel(%arg0: i32, %arg1: memref<2x48xf32, #tpu.memory_space<vmem>>, %arg2: memref<48x128xf32, #tpu.memory_space<vmem>>, %arg3: memref<1x128xf32, #tpu.memory_space<vmem>>, %arg4: memref<2x128xf32, #tpu.memory_space<vmem>>) attributes {dimension_semantics = [#tpu.dimension_semantics<parallel>], iteration_bounds = array<i64: 1>, scalar_prefetch = 0 : i64, scratch_operands = 0 : i64, tpu.core_type = #tpu.core_type<tc>, window_params = [{transform_indices = @transform_0, window_bounds = array<i64: 2, 48>}, {pipeline_mode = #tpu.pipeline_mode<synchronous>, transform_indices = @transform_1, window_bounds = array<i64: 48, 128>}, {pipeline_mode = #tpu.pipeline_mode<synchronous>, transform_indices = @transform_2, window_bounds = array<i64: 1, 128>}, {transform_indices = @transform_3, window_bounds = array<i64: 2, 128>}]} {
    %c0 = arith.constant 0 : index
    %c0_0 = arith.constant 0 : index
    %0 = vector.load %arg1[%c0, %c0_0] : memref<2x48xf32, #tpu.memory_space<vmem>>, vector<2x48xf32>
    %c0_1 = arith.constant 0 : index
    %c0_2 = arith.constant 0 : index
    %1 = vector.load %arg2[%c0_1, %c0_2] : memref<48x128xf32, #tpu.memory_space<vmem>>, vector<48x128xf32>
    %cst = arith.constant dense<0.000000e+00> : vector<2x128xf32>
    %2 = tpu.matmul %0, %1, %cst {dimension_numbers = #tpu.dot_dimension_numbers<[1], [0], [0], [1], [0, 0, 1, 1], [], []>} : vector<2x48xf32>, vector<48x128xf32>, vector<2x128xf32> -> vector<2x128xf32>
    %c0_3 = arith.constant 0 : index
    %c0_4 = arith.constant 0 : index
    %3 = vector.load %arg3[%c0_3, %c0_4] : memref<1x128xf32, #tpu.memory_space<vmem>>, vector<1x128xf32>
    %4 = vector.broadcast %3 : vector<1x128xf32> to vector<2x128xf32>
    %5 = arith.addf %2, %4 : vector<2x128xf32>
    %c0_5 = arith.constant 0 : index
    %c0_6 = arith.constant 0 : index
    %6 = vector.load %arg4[%c0_5, %c0_6] : memref<2x128xf32, #tpu.memory_space<vmem>>, vector<2x128xf32>
    tpu.vector_store %arg4[%c0_5, %c0_6], %5 {strides = array<i32>} : memref<2x128xf32, #tpu.memory_space<vmem>>, vector<2x128xf32>,
    return
  }
  func.func @transform_0(%arg0: i32) -> (i32, i32) {
    %c0_i32 = arith.constant 0 : i32
    %c0_i32_0 = arith.constant 0 : i32
    return %arg0, %c0_i32 : i32, i32
  }
  func.func @transform_1(%arg0: i32) -> (i32, i32) {
    %c0_i32 = arith.constant 0 : i32
    %c0_i32_0 = arith.constant 0 : i32
    %c0_i32_1 = arith.constant 0 : i32
    return %c0_i32, %c0_i32_0 : i32, i32
  }
  func.func @transform_2(%arg0: i32) -> (i32, i32) {
    %c0_i32 = arith.constant 0 : i32
    %c0_i32_0 = arith.constant 0 : i32
    %c0_i32_1 = arith.constant 0 : i32
    return %c0_i32, %c0_i32_0 : i32, i32
  }
  func.func @transform_3(%arg0: i32) -> (i32, i32) {
    %c0_i32 = arith.constant 0 : i32
    %c0_i32_0 = arith.constant 0 : i32
    return %arg0, %c0_i32 : i32, i32
  }
}

module attributes {stable_mosaic.version = 11 : i64} {
  func.func @_fused_kernel(%arg0: i32, %arg1: memref<2x48xf32, #tpu.memory_space<vmem>>, %arg2: memref<48x128xf32, #tpu.memory_space<vmem>>, %arg3: memref<1x128xf32, #tpu.memory_space<vmem>>, %arg4: memref<2x128xf32, #tpu.memory_space<vmem>>) attributes {dimension_semantics = [#tpu.dimension_semantics<parallel>], iteration_bounds = array<i64: 1>, scalar_prefetch = 0 : i64, scratch_operands = 0 : i64, tpu.core_type = #tpu.core_type<tc>, window_params = [{transform_indices = @transform_0, window_bounds = array<i64: 2, 48>}, {pipeline_mode = #tpu.pipeline_mode<synchronous>, transform_indices = @transform_1, window_bounds = array<i64: 48, 128>}, {pipeline_mode = #tpu.pipeline_mode<synchronous>, transform_indices = @transform_2, window_bounds = array<i64: 1, 128>}, {transform_indices = @transform_3, window_bounds = array<i64: 2, 128>}]} {
    %c0 = arith.constant 0 : index
    %c0_0 = arith.constant 0 : index
    %0 = vector.load %arg1[%c0, %c0_0] : memref<2x48xf32, #tpu.memory_space<vmem>>, vector<2x48xf32>
    %c0_1 = arith.constant 0 : index
    %c0_2 = arith.constant 0 : index
    %1 = vector.load %arg2[%c0_1, %c0_2] : memref<48x128xf32, #tpu.memory_space<vmem>>, vector<48x128xf32>
    %cst = arith.constant dense<0.000000e+00> : vector<2x128xf32>
    %2 = tpu.matmul %0, %1, %cst {dimension_numbers = #tpu.dot_dimension_numbers<[1], [0], [0], [1], [0, 0, 1, 1], [], []>} : vector<2x48xf32>, vector<48x128xf32>, vector<2x128xf32> -> vector<2x128xf32>
    %c0_3 = arith.constant 0 : index
    %c0_4 = arith.constant 0 : index
    %3 = vector.load %arg3[%c0_3, %c0_4] : memref<1x128xf32, #tpu.memory_space<vmem>>, vector<1x128xf32>
    %4 = vector.broadcast %3 : vector<1x128xf32> to vector<2x128xf32>
    %5 = arith.addf %2, %4 : vector<2x128xf32>
    %c0_5 = arith.constant 0 : index
    %c0_6 = arith.constant 0 : index
    %6 = vector.load %arg4[%c0_5, %c0_6] : memref<2x128xf32, #tpu.memory_space<vmem>>, vector<2x128xf32>
    tpu.vector_store %arg4[%c0_5, %c0_6], %5 {strides = array<i32>} : memref<2x128xf32, #tpu.memory_space<vmem>>, vector<2x128xf32>,
    return
  }
  func.func @transform_0(%arg0: i32) -> (i32, i32) {
    %c0_i32 = arith.constant 0 : i32
    %c0_i32_0 = arith.constant 0 : i32
    return %arg0, %c0_i32 : i32, i32
  }
  func.func @transform_1(%arg0: i32) -> (i32, i32) {
    %c0_i32 = arith.constant 0 : i32
    %c0_i32_0 = arith.constant 0 : i32
    %c0_i32_1 = arith.constant 0 : i32
    return %c0_i32, %c0_i32_0 : i32, i32
  }
  func.func @transform_2(%arg0: i32) -> (i32, i32) {
    %c0_i32 = arith.constant 0 : i32
    %c0_i32_0 = arith.constant 0 : i32
    %c0_i32_1 = arith.constant 0 : i32
    return %c0_i32, %c0_i32_0 : i32, i32
  }
  func.func @transform_3(%arg0: i32) -> (i32, i32) {
    %c0_i32 = arith.constant 0 : i32
    %c0_i32_0 = arith.constant 0 : i32
    return %arg0, %c0_i32 : i32, i32
  }
}

</mosaic_0001>

<bundles_post_ra>
// kernel: tpu_custom_call.1
= control target key start
LH: loop header
LB: loop body
LE: loop exit
PB: predicated region body
PF: predicated region fallthrough
CT: control target
= control target key end

     0   :  { %8 = vsyncpa [#allocation3], 0  ;;  %s282_s0 = inlined_call_operand.hbm [shape: f32[2,48], index: 0, kind: input, shape index: {}]   ;;  %s283_s1 = inlined_call_operand.hbm [shape: f32[48,128], index: 1, kind: input, shape index: {}]   ;;  %s284_s2 = inlined_call_operand.vmem [shape: f32[1,128], index: 2, kind: input, shape index: {}]   ;;  %s285_s3 = inlined_call_operand.hbm [shape: f32[2,128], index: 3, kind: output, shape index: {}]  }
   0x1   :  { %9 = vsyncpa [#allocation6], 0 }
   0x2   :  { %10 = vsyncpa [#allocation4], 0  ;;  %s243_s12 = smov [#allocation2]   ;;  %s244_s14 = smov [#allocation5]  }
   0x3   :  { %s17_s13 = sshll.u32 %s243_s12, 4  ;;  %s26_s15 = sshll.u32 %s244_s14, 4  ;;  %s18_s13 = int_to_ptr.vmem [resolvable:$true] %s17_s13  ;;  %s27_s15 = int_to_ptr.vmem [resolvable:$true] %s26_s15 }
   0x4   :  { %s185_s16 = scalar_lea.vmem %s18_s13, 32  ;;  %p190_p1 = scmp.lt.s32.totalorder %s18_s13, %s18_s13 }
   0x5   :  { %p186_p0 = scmp.ne.s32.totalorder %s18_s13, %s185_s16  ;;  %p191_p2 = scmp.lt.s32.totalorder %s185_s16, %s185_s16 }
   0x7   :  { %p192_p3 = por %p191_p2, %p190_p1 }
   0x9   :  { %p193_p4 = pnand %p192_p3, %p186_p0 }
   0xb   :  { %196 = shalt.err (!%p193_p4)
}
   0xc   :  { %20 = dma.hbm_to_vmem [thread:$0]  %s282_s0, 32, %s18_s13, [#allocation3]  }
   0xd   :  { %s205_s19 = scalar_lea.vmem %s27_s15, 768  ;;  %p210_p6 = scmp.lt.s32.totalorder %s27_s15, %s27_s15 }
   0xe   :  { %p206_p5 = scmp.ne.s32.totalorder %s27_s15, %s205_s19  ;;  %p211_p7 = scmp.lt.s32.totalorder %s205_s19, %s205_s19 }
  0x10   :  { %p212_p8 = por %p211_p7, %p210_p6 }
  0x12   :  { %p213_p9 = pnand %p212_p8, %p206_p5 }
  0x14   :  { %216 = shalt.err (!%p213_p9)
}
  0x15   :  { %s245_s20 = smov 128   ;;  %s246_s21 = smov 8  }
  0x16   :  { %32 = dma.hbm_to_vmem [thread:$0]  %s283_s1, 768, %s27_s15, [#allocation6], %s245_s20, %s245_s20, %s246_s21  }
  0x17   :  { %237 = dma.done.wait [#allocation3], 32  }
  0x18   :  { %238 = vsyncadd [#allocation3], 4294967264 }
  0x19   :  { %239 = dma.done.wait [#allocation6], 768  }
  0x1a   :  { %240 = vsyncadd [#allocation6], 4294966528  ;;  %v247_v0 = vmov 0.0   ;;  %vm248_vm0 = vmmov 0   ;;  %v47_v1 = vld [vmem:[#allocation5 + $0x28] sm:$0xff]  ;;  %v46_v2 = vld [vmem:[#allocation5 + $0x20] sm:$0xff] }
  0x1b   :  { %155 = vmatprep.subr.mxu0 %v247_v0  ;;  %167 = vmatprep.mubr.msk.f32.mxu0 %vm248_vm0, %v247_v0  ;;  %v45_v3 = vld [vmem:[#allocation5 + $0x18] sm:$0xff]  ;;  %v44_v4 = vld [vmem:[#allocation5 + $0x10] sm:$0xff]  ;;  %v43_v5 = vld [vmem:[#allocation5 + $0x8] sm:$0xff]  ;;  %vm55_vm1 = vcmask 392192   ;;  %s249_s24 = smov [#allocation7]  }
  0x1c   :  { %156 = vmatpush3.msra.mxu0 %v47_v1  ;;  %v42_v6 = vld [vmem:[#allocation5] sm:$0xff]  ;;  %v41_v7 = vld [vmem:[#allocation2] sm:$0x3]  ;;  %s136_s25 = sshll.u32 %s249_s24, 4  ;;  %s137_s25 = int_to_ptr.vmem [resolvable:$true] %s136_s25 }
  0x1d   :  { %157 = vmatprep.subr.mxu0 %v247_v0  ;;  %v146_v8 = vld [vmem:[%s284_s2] ss:$0 sm:$0xff]  ;;  %s217_s26 = scalar_lea.vmem %s137_s25, 32  ;;  %p222_p11 = scmp.lt.s32.totalorder %s137_s25, %s137_s25 }
  0x1e   :  { %158 = vmatpush3.msra.mxu0 %v46_v2  ;;  %p218_p10 = scmp.ne.s32.totalorder %s137_s25, %s217_s26  ;;  %p223_p12 = scmp.lt.s32.totalorder %s217_s26, %s217_s26 }
  0x1f   :  { %159 = vmatprep.subr.mxu0 %v247_v0 }
  0x20   :  { %160 = vmatpush3.msra.mxu0 %v45_v3  ;;  %p224_p13 = por %p223_p12, %p222_p11 }
  0x21   :  { %161 = vmatprep.subr.mxu0 %v247_v0 }
  0x22   :  { %162 = vmatpush3.msra.mxu0 %v44_v4  ;;  %p225_p0 = pnand %p224_p13, %p218_p10 }
  0x23   :  { %163 = vmatprep.subr.mxu0 %v247_v0 }
  0x24   :  { %164 = vmatpush3.msra.mxu0 %v43_v5 }
  0x25   :  { %165 = vmatprep.subr.mxu0 %v247_v0 }
  0x26   :  { %166 = vmatpush3.msra.mxu0 %v42_v6 }
  0x27   :  { %168 = vmatmul.mubr.msk.f32.vlgmr.msra.gmra.mxu0 %vm55_vm1, %v41_v7 }
  0xe7   :  { %v125_v9 = vpop.f32.mrf.mxu0 }
  0xe8   :  { %v126_v10 = vadd.f32 %v146_v8, %v125_v9 }
  0xe9   :  { %v169_v11 = vpop.f32.mrf.mxu0 }
  0xea   :  { %129 = vst [vmem:[#allocation7] sm:$0x3] %v126_v10 }
  0xeb   :  { %228 = shalt.err (!%p225_p0)
}
  0xec   :  { %139 = dma.vmem_to_hbm [thread:$0]  %s137_s25, 32, %s285_s3, [#allocation4]  }
  0xed   :  { %241 = dma.done.wait [#allocation4], 32  }
  0xee   :  { %242 = vsyncadd [#allocation4], 4294967264 }
  0xef   :  { %143 = vsyncpa [#allocation3], 1 }
  0xf0   :  { %144 = vsyncpa [#allocation6], 1 }
  0xf1   :  { %145 = vsyncpa [#allocation4], 1 }

// kernel: tpu_custom_call.1
= control target key start
LH: loop header
LB: loop body
LE: loop exit
PB: predicated region body
PF: predicated region fallthrough
CT: control target
= control target key end

     0   :  { %8 = vsyncpa [#allocation3], 0  ;;  %s282_s0 = inlined_call_operand.hbm [shape: f32[2,48], index: 0, kind: input, shape index: {}]   ;;  %s283_s1 = inlined_call_operand.hbm [shape: f32[48,128], index: 1, kind: input, shape index: {}]   ;;  %s284_s2 = inlined_call_operand.vmem [shape: f32[1,128], index: 2, kind: input, shape index: {}]   ;;  %s285_s3 = inlined_call_operand.hbm [shape: f32[2,128], index: 3, kind: output, shape index: {}]  }
   0x1   :  { %9 = vsyncpa [#allocation6], 0 }
   0x2   :  { %10 = vsyncpa [#allocation4], 0  ;;  %s243_s12 = smov [#allocation2]   ;;  %s244_s14 = smov [#allocation5]  }
   0x3   :  { %s17_s13 = sshll.u32 %s243_s12, 4  ;;  %s26_s15 = sshll.u32 %s244_s14, 4  ;;  %s18_s13 = int_to_ptr.vmem [resolvable:$true] %s17_s13  ;;  %s27_s15 = int_to_ptr.vmem [resolvable:$true] %s26_s15 }
   0x4   :  { %s185_s16 = scalar_lea.vmem %s18_s13, 32  ;;  %p190_p1 = scmp.lt.s32.totalorder %s18_s13, %s18_s13 }
   0x5   :  { %p186_p0 = scmp.ne.s32.totalorder %s18_s13, %s185_s16  ;;  %p191_p2 = scmp.lt.s32.totalorder %s185_s16, %s185_s16 }
   0x7   :  { %p192_p3 = por %p191_p2, %p190_p1 }
   0x9   :  { %p193_p4 = pnand %p192_p3, %p186_p0 }
   0xb   :  { %196 = shalt.err (!%p193_p4)
}
   0xc   :  { %20 = dma.hbm_to_vmem [thread:$0]  %s282_s0, 32, %s18_s13, [#allocation3]  }
   0xd   :  { %s205_s19 = scalar_lea.vmem %s27_s15, 768  ;;  %p210_p6 = scmp.lt.s32.totalorder %s27_s15, %s27_s15 }
   0xe   :  { %p206_p5 = scmp.ne.s32.totalorder %s27_s15, %s205_s19  ;;  %p211_p7 = scmp.lt.s32.totalorder %s205_s19, %s205_s19 }
  0x10   :  { %p212_p8 = por %p211_p7, %p210_p6 }
  0x12   :  { %p213_p9 = pnand %p212_p8, %p206_p5 }
  0x14   :  { %216 = shalt.err (!%p213_p9)
}
  0x15   :  { %s245_s20 = smov 128   ;;  %s246_s21 = smov 8  }
  0x16   :  { %32 = dma.hbm_to_vmem [thread:$0]  %s283_s1, 768, %s27_s15, [#allocation6], %s245_s20, %s245_s20, %s246_s21  }
  0x17   :  { %237 = dma.done.wait [#allocation3], 32  }
  0x18   :  { %238 = vsyncadd [#allocation3], 4294967264 }
  0x19   :  { %239 = dma.done.wait [#allocation6], 768  }
  0x1a   :  { %240 = vsyncadd [#allocation6], 4294966528  ;;  %v247_v0 = vmov 0.0   ;;  %vm248_vm0 = vmmov 0   ;;  %v47_v1 = vld [vmem:[#allocation5 + $0x28] sm:$0xff]  ;;  %v46_v2 = vld [vmem:[#allocation5 + $0x20] sm:$0xff] }
  0x1b   :  { %155 = vmatprep.subr.mxu0 %v247_v0  ;;  %167 = vmatprep.mubr.msk.f32.mxu0 %vm248_vm0, %v247_v0  ;;  %v45_v3 = vld [vmem:[#allocation5 + $0x18] sm:$0xff]  ;;  %v44_v4 = vld [vmem:[#allocation5 + $0x10] sm:$0xff]  ;;  %v43_v5 = vld [vmem:[#allocation5 + $0x8] sm:$0xff]  ;;  %vm55_vm1 = vcmask 392192   ;;  %s249_s24 = smov [#allocation7]  }
  0x1c   :  { %156 = vmatpush3.msra.mxu0 %v47_v1  ;;  %v42_v6 = vld [vmem:[#allocation5] sm:$0xff]  ;;  %v41_v7 = vld [vmem:[#allocation2] sm:$0x3]  ;;  %s136_s25 = sshll.u32 %s249_s24, 4  ;;  %s137_s25 = int_to_ptr.vmem [resolvable:$true] %s136_s25 }
  0x1d   :  { %157 = vmatprep.subr.mxu0 %v247_v0  ;;  %v146_v8 = vld [vmem:[%s284_s2] ss:$0 sm:$0xff]  ;;  %s217_s26 = scalar_lea.vmem %s137_s25, 32  ;;  %p222_p11 = scmp.lt.s32.totalorder %s137_s25, %s137_s25 }
  0x1e   :  { %158 = vmatpush3.msra.mxu0 %v46_v2  ;;  %p218_p10 = scmp.ne.s32.totalorder %s137_s25, %s217_s26  ;;  %p223_p12 = scmp.lt.s32.totalorder %s217_s26, %s217_s26 }
  0x1f   :  { %159 = vmatprep.subr.mxu0 %v247_v0 }
  0x20   :  { %160 = vmatpush3.msra.mxu0 %v45_v3  ;;  %p224_p13 = por %p223_p12, %p222_p11 }
  0x21   :  { %161 = vmatprep.subr.mxu0 %v247_v0 }
  0x22   :  { %162 = vmatpush3.msra.mxu0 %v44_v4  ;;  %p225_p0 = pnand %p224_p13, %p218_p10 }
  0x23   :  { %163 = vmatprep.subr.mxu0 %v247_v0 }
  0x24   :  { %164 = vmatpush3.msra.mxu0 %v43_v5 }
  0x25   :  { %165 = vmatprep.subr.mxu0 %v247_v0 }
  0x26   :  { %166 = vmatpush3.msra.mxu0 %v42_v6 }
  0x27   :  { %168 = vmatmul.mubr.msk.f32.vlgmr.msra.gmra.mxu0 %vm55_vm1, %v41_v7 }
  0xe7   :  { %v125_v9 = vpop.f32.mrf.mxu0 }
  0xe8   :  { %v126_v10 = vadd.f32 %v146_v8, %v125_v9 }
  0xe9   :  { %v169_v11 = vpop.f32.mrf.mxu0 }
  0xea   :  { %129 = vst [vmem:[#allocation7] sm:$0x3] %v126_v10 }
  0xeb   :  { %228 = shalt.err (!%p225_p0)
}
  0xec   :  { %139 = dma.vmem_to_hbm [thread:$0]  %s137_s25, 32, %s285_s3, [#allocation4]  }
  0xed   :  { %241 = dma.done.wait [#allocation4], 32  }
  0xee   :  { %242 = vsyncadd [#allocation4], 4294967264 }
  0xef   :  { %143 = vsyncpa [#allocation3], 1 }
  0xf0   :  { %144 = vsyncpa [#allocation6], 1 }
  0xf1   :  { %145 = vsyncpa [#allocation4], 1 }

</bundles_post_ra>
